<compile_context>
chip_gen: v7x
topology: tpu7x:2x2x1
jax: 0.10.0
libtpu: 0.0.40
codegen_flags: <defaults>
</compile_context>

<pallas_src>
import functools

import jax
import jax.numpy as jnp
from jax.experimental import pallas as pl
from jax.experimental.pallas import tpu as pltpu

HIDDEN_PAD = 128   # hidden width padded 100 -> 128 (lane-dense, full MXU tile)
OUT_PAD = 8        # output width padded 3 -> 8 (narrow HBM writes: 32 B/row)


def _round_up(x, m):
    return (x + m - 1) // m * m


def _pad2(a, rows, cols):
    return jnp.pad(a, ((0, rows - a.shape[0]), (0, cols - a.shape[1])))


def _quant_mlp_kernel(x_ref, w1_ref, b1_ref, w2_ref, b2_ref, w3_ref, b3_ref, o_ref):
    # Layer 1: Linear(F -> 128) + ReLU  (f32 accumulation on the MXU)
    h1 = jnp.dot(x_ref[...], w1_ref[...], preferred_element_type=jnp.float32)
    h1 = jnp.maximum(h1 + b1_ref[...], 0.0)
    # Layer 2: Linear(128 -> 128) + ReLU  (exact 128x128 MXU tile)
    h2 = jnp.dot(h1.astype(w2_ref.dtype), w2_ref[...], preferred_element_type=jnp.float32)
    h2 = jnp.maximum(h2 + b2_ref[...], 0.0)
    # Layer 3: Linear(128 -> OUT_PAD), no activation; narrow 8-lane store.
    out = jnp.dot(h2.astype(w3_ref.dtype), w3_ref[...], preferred_element_type=jnp.float32)
    o_ref[...] = (out + b3_ref[...]).astype(o_ref.dtype)


@functools.partial(jax.jit, static_argnames=("tile_m", "compute_dtype"))
def quant_model_forward(x, params, *, tile_m=8192, compute_dtype=jnp.float32):
    """x: [B, in_features] float32. params: natural-shape (w[in,out], b[1,out]) tuple.

    Returns [B, out_quantiles] float32.  On v5e prefer compute_dtype=jnp.bfloat16
    (f32 MXU is emulated there); accumulation stays f32 either way.
    """
    w1, b1, w2, b2, w3, b3 = params
    B, F = x.shape
    out_q = w3.shape[1]
    assert out_q <= OUT_PAD and w1.shape[1] <= HIDDEN_PAD and w2.shape[1] <= HIDDEN_PAD

    # ---- host-side zero padding to hardware-friendly shapes (math unchanged) ----
    w1p = _pad2(w1, F, HIDDEN_PAD).astype(compute_dtype)
    b1p = _pad2(b1, 1, HIDDEN_PAD).astype(jnp.float32)
    w2p = _pad2(w2, HIDDEN_PAD, HIDDEN_PAD).astype(compute_dtype)
    b2p = _pad2(b2, 1, HIDDEN_PAD).astype(jnp.float32)
    w3p = _pad2(w3, HIDDEN_PAD, OUT_PAD).astype(compute_dtype)
    b3p = _pad2(b3, 1, OUT_PAD).astype(jnp.float32)

    # ---- batch tiling ----
    # bf16 packs two rows per sublane -> round the batch tile to 16 in that case so
    # x/out blocks stay cleanly packed; f32 only needs 8-row alignment.
    row_align = 16 if jnp.dtype(compute_dtype).itemsize == 2 else 8
    tm = min(tile_m, _round_up(B, row_align))
    tm = _round_up(tm, row_align)
    b_pad = _round_up(B, tm)
    xk = x.astype(compute_dtype)
    if b_pad != B:
        xk = jnp.pad(xk, ((0, b_pad - B), (0, 0)))
    grid = (b_pad // tm,)

    dtype_size = jnp.dtype(compute_dtype).itemsize
    weight_bytes = ((w1p.size + w2p.size + w3p.size) * dtype_size
                    + (b1p.size + b2p.size + b3p.size) * 4)
    cost = pl.CostEstimate(
        flops=2 * b_pad * (F * HIDDEN_PAD + HIDDEN_PAD * HIDDEN_PAD + HIDDEN_PAD * OUT_PAD),
        transcendentals=0,
        bytes_accessed=b_pad * F * dtype_size + b_pad * OUT_PAD * 4 + weight_bytes,
    )

    const = lambda i: (0, 0)  # weights/biases: fetched once, resident across grid steps
    out_padded = pl.pallas_call(
        _quant_mlp_kernel,
        out_shape=jax.ShapeDtypeStruct((b_pad, OUT_PAD), jnp.float32),
        grid=grid,
        in_specs=[
            pl.BlockSpec((tm, F), lambda i: (i, 0)),          # x tile (streamed)
            pl.BlockSpec((F, HIDDEN_PAD), const),             # w1
            pl.BlockSpec((1, HIDDEN_PAD), const),             # b1
            pl.BlockSpec((HIDDEN_PAD, HIDDEN_PAD), const),    # w2
            pl.BlockSpec((1, HIDDEN_PAD), const),             # b2
            pl.BlockSpec((HIDDEN_PAD, OUT_PAD), const),       # w3
            pl.BlockSpec((1, OUT_PAD), const),                # b3
        ],
        out_specs=pl.BlockSpec((tm, OUT_PAD), lambda i: (i, 0)),
        compiler_params=pltpu.CompilerParams(
            # On v7x, if profiling shows a single TC engaged, switch this axis to
            # pltpu.CORE_PARALLEL to split the batch grid across both TensorCores.
            dimension_semantics=("parallel",),
            vmem_limit_bytes=32 * 1024 * 1024,
        ),
        cost_estimate=cost,
    )(xk, w1p, b1p, w2p, b2p, w3p, b3p)

    return out_padded[:B, :out_q]


def init_params(key, in_tabular_features=9, hidden=100, out_quantiles=3):
    """Deterministic PyTorch-style (uniform +-1/sqrt(fan_in)) init; natural shapes."""
    ks = jax.random.split(key, 6)

    def linear(kw, kb, fan_in, fan_out):
        bound = 1.0 / jnp.sqrt(jnp.float32(fan_in))
        w = jax.random.uniform(kw, (fan_in, fan_out), jnp.float32, -bound, bound)
        b = jax.random.uniform(kb, (1, fan_out), jnp.float32, -bound, bound)
        return w, b

    w1, b1 = linear(ks[0], ks[1], in_tabular_features, hidden)
    w2, b2 = linear(ks[2], ks[3], hidden, hidden)
    w3, b3 = linear(ks[4], ks[5], hidden, out_quantiles)
    return (w1, b1, w2, b2, w3, b3)


def _reference(x, params):
    w1, b1, w2, b2, w3, b3 = params
    h = jnp.maximum(x @ w1 + b1, 0.0)
    h = jnp.maximum(h @ w2 + b2, 0.0)
    return h @ w3 + b3


if __name__ == "__main__":
    key = jax.random.PRNGKey(0)
    k_params, k_x, k_x2 = jax.random.split(key, 3)

    in_features = 9
    out_quantiles = 3
    batch = 8

    params = init_params(k_params, in_features, 100, out_quantiles)
    x = jax.random.normal(k_x, (batch, in_features), jnp.float32)

    # f32 path (exact semantics)
    out = jax.block_until_ready(quant_model_forward(x, params))
    ref = _reference(x, params)
    assert out.shape == (batch, out_quantiles)
    assert jnp.allclose(out, ref, atol=1e-4, rtol=1e-4)

    # exercise batch padding / multi-tile path with a non-multiple-of-8 batch
    x2 = jax.random.normal(k_x2, (37, in_features), jnp.float32)
    out2 = jax.block_until_ready(quant_model_forward(x2, params, tile_m=16))
    ref2 = _reference(x2, params)
    assert out2.shape == (37, out_quantiles)
    assert jnp.allclose(out2, ref2, atol=1e-4, rtol=1e-4)

    # bf16 input/weight stream (f32 accumulation, 16-row aligned tiles) — relaxed tolerance
    out_bf16 = jax.block_until_ready(
        quant_model_forward(x, params, compute_dtype=jnp.bfloat16)
    )
    assert out_bf16.shape == (batch, out_quantiles)
    assert jnp.allclose(out_bf16, ref, atol=5e-2, rtol=5e-2)

    # bf16 multi-tile path with non-multiple-of-16 batch
    out2_bf16 = jax.block_until_ready(
        quant_model_forward(x2, params, tile_m=32, compute_dtype=jnp.bfloat16)
    )
    assert out2_bf16.shape == (37, out_quantiles)
    assert jnp.allclose(out2_bf16, ref2, atol=5e-2, rtol=5e-2)

    print("KERNEL_OK")
</pallas_src>

<mosaic_0001>
module attributes {stable_mosaic.version = 11 : i64} {
  func.func @_quant_mlp_kernel(%arg0: i32, %arg1: memref<8x9xf32, #tpu.memory_space<vmem>>, %arg2: memref<9x128xf32, #tpu.memory_space<vmem>>, %arg3: memref<1x128xf32, #tpu.memory_space<vmem>>, %arg4: memref<128x128xf32, #tpu.memory_space<vmem>>, %arg5: memref<1x128xf32, #tpu.memory_space<vmem>>, %arg6: memref<128x8xf32, #tpu.memory_space<vmem>>, %arg7: memref<1x8xf32, #tpu.memory_space<vmem>>, %arg8: memref<8x8xf32, #tpu.memory_space<vmem>>) attributes {dimension_semantics = [#tpu.dimension_semantics<parallel>], iteration_bounds = array<i64: 1>, scalar_prefetch = 0 : i64, scratch_operands = 0 : i64, tpu.core_type = #tpu.core_type<tc>, window_params = [{transform_indices = @transform_0, window_bounds = array<i64: 8, 9>}, {pipeline_mode = #tpu.pipeline_mode<synchronous>, transform_indices = @transform_1, window_bounds = array<i64: 9, 128>}, {pipeline_mode = #tpu.pipeline_mode<synchronous>, transform_indices = @transform_2, window_bounds = array<i64: 1, 128>}, {pipeline_mode = #tpu.pipeline_mode<synchronous>, transform_indices = @transform_3, window_bounds = array<i64: 128, 128>}, {pipeline_mode = #tpu.pipeline_mode<synchronous>, transform_indices = @transform_4, window_bounds = array<i64: 1, 128>}, {pipeline_mode = #tpu.pipeline_mode<synchronous>, transform_indices = @transform_5, window_bounds = array<i64: 128, 8>}, {pipeline_mode = #tpu.pipeline_mode<synchronous>, transform_indices = @transform_6, window_bounds = array<i64: 1, 8>}, {transform_indices = @transform_7, window_bounds = array<i64: 8, 8>}]} {
    %c0 = arith.constant 0 : index
    %c0_0 = arith.constant 0 : index
    %0 = vector.load %arg1[%c0, %c0_0] : memref<8x9xf32, #tpu.memory_space<vmem>>, vector<8x9xf32>
    %c0_1 = arith.constant 0 : index
    %c0_2 = arith.constant 0 : index
    %1 = vector.load %arg2[%c0_1, %c0_2] : memref<9x128xf32, #tpu.memory_space<vmem>>, vector<9x128xf32>
    %cst = arith.constant dense<0.000000e+00> : vector<8x128xf32>
    %2 = tpu.matmul %0, %1, %cst {dimension_numbers = #tpu.dot_dimension_numbers<[1], [0], [0], [1], [0, 0, 1, 1], [], []>} : vector<8x9xf32>, vector<9x128xf32>, vector<8x128xf32> -> vector<8x128xf32>
    %c0_3 = arith.constant 0 : index
    %c0_4 = arith.constant 0 : index
    %3 = vector.load %arg3[%c0_3, %c0_4] : memref<1x128xf32, #tpu.memory_space<vmem>>, vector<1x128xf32>
    %4 = vector.broadcast %3 : vector<1x128xf32> to vector<8x128xf32>
    %5 = arith.addf %2, %4 : vector<8x128xf32>
    %cst_5 = arith.constant 0.000000e+00 : f32
    %6 = vector.broadcast %cst_5 : f32 to vector<8x128xf32>
    %7 = arith.maximumf %5, %6 : vector<8x128xf32>
    %c0_6 = arith.constant 0 : index
    %c0_7 = arith.constant 0 : index
    %8 = vector.load %arg4[%c0_6, %c0_7] : memref<128x128xf32, #tpu.memory_space<vmem>>, vector<128x128xf32>
    %cst_8 = arith.constant dense<0.000000e+00> : vector<8x128xf32>
    %9 = tpu.matmul %7, %8, %cst_8 {dimension_numbers = #tpu.dot_dimension_numbers<[1], [0], [0], [1], [0, 0, 1, 1], [], []>} : vector<8x128xf32>, vector<128x128xf32>, vector<8x128xf32> -> vector<8x128xf32>
    %c0_9 = arith.constant 0 : index
    %c0_10 = arith.constant 0 : index
    %10 = vector.load %arg5[%c0_9, %c0_10] : memref<1x128xf32, #tpu.memory_space<vmem>>, vector<1x128xf32>
    %11 = vector.broadcast %10 : vector<1x128xf32> to vector<8x128xf32>
    %12 = arith.addf %9, %11 : vector<8x128xf32>
    %cst_11 = arith.constant 0.000000e+00 : f32
    %13 = vector.broadcast %cst_11 : f32 to vector<8x128xf32>
    %14 = arith.maximumf %12, %13 : vector<8x128xf32>
    %c0_12 = arith.constant 0 : index
    %c0_13 = arith.constant 0 : index
    %15 = vector.load %arg6[%c0_12, %c0_13] : memref<128x8xf32, #tpu.memory_space<vmem>>, vector<128x8xf32>
    %cst_14 = arith.constant dense<0.000000e+00> : vector<8x8xf32>
    %16 = tpu.matmul %14, %15, %cst_14 {dimension_numbers = #tpu.dot_dimension_numbers<[1], [0], [0], [1], [0, 0, 1, 1], [], []>} : vector<8x128xf32>, vector<128x8xf32>, vector<8x8xf32> -> vector<8x8xf32>
    %c0_15 = arith.constant 0 : index
    %c0_16 = arith.constant 0 : index
    %17 = vector.load %arg7[%c0_15, %c0_16] : memref<1x8xf32, #tpu.memory_space<vmem>>, vector<1x8xf32>
    %18 = vector.broadcast %17 : vector<1x8xf32> to vector<8x8xf32>
    %19 = arith.addf %16, %18 : vector<8x8xf32>
    %c0_17 = arith.constant 0 : index
    %c0_18 = arith.constant 0 : index
    %20 = vector.load %arg8[%c0_17, %c0_18] : memref<8x8xf32, #tpu.memory_space<vmem>>, vector<8x8xf32>
    tpu.vector_store %arg8[%c0_17, %c0_18], %19 {strides = array<i32>} : memref<8x8xf32, #tpu.memory_space<vmem>>, vector<8x8xf32>,
    return
  }
  func.func @transform_0(%arg0: i32) -> (i32, i32) {
    %c0_i32 = arith.constant 0 : i32
    %c0_i32_0 = arith.constant 0 : i32
    return %arg0, %c0_i32 : i32, i32
  }
  func.func @transform_1(%arg0: i32) -> (i32, i32) {
    %c0_i32 = arith.constant 0 : i32
    %c0_i32_0 = arith.constant 0 : i32
    %c0_i32_1 = arith.constant 0 : i32
    return %c0_i32, %c0_i32_0 : i32, i32
  }
  func.func @transform_2(%arg0: i32) -> (i32, i32) {
    %c0_i32 = arith.constant 0 : i32
    %c0_i32_0 = arith.constant 0 : i32
    %c0_i32_1 = arith.constant 0 : i32
    return %c0_i32, %c0_i32_0 : i32, i32
  }
  func.func @transform_3(%arg0: i32) -> (i32, i32) {
    %c0_i32 = arith.constant 0 : i32
    %c0_i32_0 = arith.constant 0 : i32
    %c0_i32_1 = arith.constant 0 : i32
    return %c0_i32, %c0_i32_0 : i32, i32
  }
  func.func @transform_4(%arg0: i32) -> (i32, i32) {
    %c0_i32 = arith.constant 0 : i32
    %c0_i32_0 = arith.constant 0 : i32
    %c0_i32_1 = arith.constant 0 : i32
    return %c0_i32, %c0_i32_0 : i32, i32
  }
  func.func @transform_5(%arg0: i32) -> (i32, i32) {
    %c0_i32 = arith.constant 0 : i32
    %c0_i32_0 = arith.constant 0 : i32
    %c0_i32_1 = arith.constant 0 : i32
    return %c0_i32, %c0_i32_0 : i32, i32
  }
  func.func @transform_6(%arg0: i32) -> (i32, i32) {
    %c0_i32 = arith.constant 0 : i32
    %c0_i32_0 = arith.constant 0 : i32
    %c0_i32_1 = arith.constant 0 : i32
    return %c0_i32, %c0_i32_0 : i32, i32
  }
  func.func @transform_7(%arg0: i32) -> (i32, i32) {
    %c0_i32 = arith.constant 0 : i32
    %c0_i32_0 = arith.constant 0 : i32
    return %arg0, %c0_i32 : i32, i32
  }
}

</mosaic_0001>

<bundles_post_ra>
// kernel: quant_model_forward.1
= control target key start
LH: loop header
LB: loop body
LE: loop exit
PB: predicated region body
PF: predicated region fallthrough
CT: control target
= control target key end

     0   :  { %vm40_vm0 = vcmask 1040384   ;;  %v483_v0 = vmov 0.0|0.0   ;;  %vm484_vm1 = vmmov 1   ;;  %vm485_vm3 = vmmov 0   ;;  %s664_s1 = inlined_call_operand.vmem [shape: f32[9,128], index: 1, kind: input, shape index: {}]   ;;  %s665_s3 = inlined_call_operand.vmem [shape: f32[128,128], index: 3, kind: input, shape index: {}]   ;;  %s666_s0 = inlined_call_operand.vmem [shape: f32[8,9], index: 0, kind: input, shape index: {}]   ;;  %s667_s5 = inlined_call_operand.vmem [shape: f32[128,8], index: 5, kind: input, shape index: {}]   ;;  %s668_s2 = inlined_call_operand.vmem [shape: f32[1,128], index: 2, kind: input, shape index: {}]   ;;  %s669_s4 = inlined_call_operand.vmem [shape: f32[1,128], index: 4, kind: input, shape index: {}]   ;;  %s670_s6 = inlined_call_operand.vmem [shape: f32[1,8], index: 6, kind: input, shape index: {}]   ;;  %s671_s7 = inlined_call_operand.vmem [shape: f32[8,8], index: 7, kind: output, shape index: {}]  }
   0x1   :  { %427 = vmatprep.subr.bf16.mxu0 %v483_v0  ;;  %v27_v1 = vld [vmem:[%s664_s1] sm:$0xff]  ;;  %v28_v2 = vld [vmem:[%s664_s1 + $0x8] sm:$0x1]  ;;  %vm429_vm2 = vmpackc.low %vm40_vm0, %vm484_vm1  ;;  %431 = vmatprep.subr.bf16.mxu1 %v483_v0  ;;  %v486_v4 = vmov 0.0   ;;  %vm36_vm4 = vcmask 72704   ;;  %vm302_vm5 = vcmask 64512  }
   0x2   :  { %v428_v3 = vpack.c.bf16 %v28_v2, %v27_v1  ;;  %354 = vmatprep.mubr.msk.f32.mxu0 %vm485_vm3, %v486_v4  ;;  %v115_v5 = vld [vmem:[%s665_s3] sm:$0xff]  ;;  %v116_v6 = vld [vmem:[%s665_s3 + $0x8] sm:$0xff]  ;;  %389 = vmatprep.mubr.msk.f32.mxu1 %vm485_vm3, %v486_v4  ;;  %v117_v8 = vld [vmem:[%s665_s3 + $0x10] sm:$0xff] }
   0x3   :  { %v432_v7 = vpack.c.bf16 %v116_v6, %v115_v5  ;;  %v118_v9 = vld [vmem:[%s665_s3 + $0x18] sm:$0xff]  ;;  %v26_v10 = vld [vmem:[%s666_s0] sm:$0xff]  ;;  %v120_v13 = vld [vmem:[%s665_s3 + $0x28] sm:$0xff] }
   0x4   :  { %430 = vmatpush3.bf16.msk.msra.mxu0 %vm429_vm2, %v428_v3  ;;  %v435_v11 = vpack.c.bf16 %v118_v9, %v117_v8  ;;  %v119_v12 = vld [vmem:[%s665_s3 + $0x20] sm:$0xff]  ;;  %v121_v15 = vld [vmem:[%s665_s3 + $0x30] sm:$0xff]  ;;  %v122_v16 = vld [vmem:[%s665_s3 + $0x38] sm:$0xff] }
   0x5   :  { %433 = vmatpush3.bf16.msra.mxu1 %v432_v7  ;;  %455 = vmatprep.subr.bf16.mxu0 %v483_v0  ;;  %v438_v14 = vpack.c.bf16 %v120_v13, %v119_v12  ;;  %v441_v17 = vpack.c.bf16 %v122_v16, %v121_v15  ;;  %v123_v18 = vld [vmem:[%s665_s3 + $0x40] sm:$0xff]  ;;  %v124_v19 = vld [vmem:[%s665_s3 + $0x48] sm:$0xff]  ;;  %v125_v21 = vld [vmem:[%s665_s3 + $0x50] sm:$0xff] }
   0x6   :  { %434 = vmatprep.subr.bf16.mxu1 %v483_v0  ;;  %v444_v20 = vpack.c.bf16 %v124_v19, %v123_v18  ;;  %v126_v22 = vld [vmem:[%s665_s3 + $0x58] sm:$0xff]  ;;  %v127_v24 = vld [vmem:[%s665_s3 + $0x60] sm:$0xff]  ;;  %v128_v25 = vld [vmem:[%s665_s3 + $0x68] sm:$0xff] }
   0x7   :  { %355 = vmatmul.mubr.msk.f32.vlgmr.msra.gmra.mrb[0].mxu0 %vm36_vm4, %v26_v10  ;;  %v447_v23 = vpack.c.bf16 %v126_v22, %v125_v21  ;;  %v450_v26 = vpack.c.bf16 %v128_v25, %v127_v24  ;;  %v129_v27 = vld [vmem:[%s665_s3 + $0x70] sm:$0xff]  ;;  %v130_v28 = vld [vmem:[%s665_s3 + $0x78] sm:$0xff]  ;;  %v209_v30 = vld [vmem:[%s667_s5] sm:$0xff] }
   0x8   :  { %424 = vmatprep.mubr.msk.f32.mxu0 %vm485_vm3, %v486_v4  ;;  %v453_v29 = vpack.c.bf16 %v130_v28, %v129_v27  ;;  %v210_v31 = vld [vmem:[%s667_s5 + $0x8] sm:$0xff]  ;;  %v211_v32 = vld [vmem:[%s667_s5 + $0x10] sm:$0xff]  ;;  %v212_v34 = vld [vmem:[%s667_s5 + $0x18] sm:$0xff] }
   0x9   :  { %436 = vmatpush3.bf16.msra.mxu1 %v435_v11  ;;  %v456_v33 = vpack.c.bf16 %v210_v31, %v209_v30  ;;  %v459_v35 = vpack.c.bf16 %v212_v34, %v211_v32  ;;  %v213_v36 = vld [vmem:[%s667_s5 + $0x20] sm:$0xff]  ;;  %v214_v37 = vld [vmem:[%s667_s5 + $0x28] sm:$0xff]  ;;  %v215_v39 = vld [vmem:[%s667_s5 + $0x30] sm:$0xff] }
   0xa   :  { %437 = vmatprep.subr.bf16.mxu1 %v483_v0  ;;  %v462_v38 = vpack.c.bf16 %v214_v37, %v213_v36  ;;  %v216_v40 = vld [vmem:[%s667_s5 + $0x38] sm:$0xff]  ;;  %v217_v42 = vld [vmem:[%s667_s5 + $0x40] sm:$0xff]  ;;  %v218_v43 = vld [vmem:[%s667_s5 + $0x48] sm:$0xff] }
   0xb   :  { %457 = vmatpush3.bf16.msra.mxu0 %v456_v33  ;;  %v465_v41 = vpack.c.bf16 %v216_v40, %v215_v39  ;;  %v468_v44 = vpack.c.bf16 %v218_v43, %v217_v42  ;;  %v219_v45 = vld [vmem:[%s667_s5 + $0x50] sm:$0xff]  ;;  %v220_v46 = vld [vmem:[%s667_s5 + $0x58] sm:$0xff]  ;;  %v221_v48 = vld [vmem:[%s667_s5 + $0x60] sm:$0xff] }
   0xc   :  { %458 = vmatprep.subr.bf16.mxu0 %v483_v0  ;;  %v471_v47 = vpack.c.bf16 %v220_v46, %v219_v45  ;;  %v222_v49 = vld [vmem:[%s667_s5 + $0x68] sm:$0xff]  ;;  %v308_v51 = vld [vmem:[%s668_s2] ss:$0 sm:$0xff]  ;;  %v223_v56 = vld [vmem:[%s667_s5 + $0x70] sm:$0xff] }
   0xd   :  { %439 = vmatpush3.bf16.msra.mxu1 %v438_v14  ;;  %v474_v50 = vpack.c.bf16 %v222_v49, %v221_v48  ;;  %v224_v57 = vld [vmem:[%s667_s5 + $0x78] sm:$0xff]  ;;  %v311_v59 = vld [vmem:[%s669_s4] ss:$0 sm:$0xff] }
   0xe   :  { %440 = vmatprep.subr.bf16.mxu1 %v483_v0  ;;  %v477_v58 = vpack.c.bf16 %v224_v57, %v223_v56 }
   0xf   :  { %460 = vmatpush3.bf16.msra.mxu0 %v459_v35 }
  0x10   :  { %461 = vmatprep.subr.bf16.mxu0 %v483_v0 }
  0x11   :  { %442 = vmatpush3.bf16.msra.mxu1 %v441_v17 }
  0x12   :  { %443 = vmatprep.subr.bf16.mxu1 %v483_v0 }
  0x13   :  { %463 = vmatpush3.bf16.msra.mxu0 %v462_v38 }
  0x14   :  { %464 = vmatprep.subr.bf16.mxu0 %v483_v0 }
  0x15   :  { %445 = vmatpush3.bf16.msra.mxu1 %v444_v20 }
  0x16   :  { %446 = vmatprep.subr.bf16.mxu1 %v483_v0 }
  0x17   :  { %466 = vmatpush3.bf16.msra.mxu0 %v465_v41 }
  0x18   :  { %467 = vmatprep.subr.bf16.mxu0 %v483_v0 }
  0x19   :  { %448 = vmatpush3.bf16.msra.mxu1 %v447_v23 }
  0x1a   :  { %449 = vmatprep.subr.bf16.mxu1 %v483_v0 }
  0x1b   :  { %469 = vmatpush3.bf16.msra.mxu0 %v468_v44 }
  0x1c   :  { %470 = vmatprep.subr.bf16.mxu0 %v483_v0 }
  0x1d   :  { %451 = vmatpush3.bf16.msra.mxu1 %v450_v26 }
  0x1e   :  { %452 = vmatprep.subr.bf16.mxu1 %v483_v0 }
  0x1f   :  { %472 = vmatpush3.bf16.msra.mxu0 %v471_v47 }
  0x20   :  { %473 = vmatprep.subr.bf16.mxu0 %v483_v0 }
  0x21   :  { %454 = vmatpush3.bf16.msra.mxu1 %v453_v29 }
  0x23   :  { %475 = vmatpush3.bf16.msra.mxu0 %v474_v50 }
  0x24   :  { %476 = vmatprep.subr.bf16.mxu0 %v483_v0  ;;  %v312_v0 = vld [vmem:[%s670_s6] ss:$0 sm:$0xff] }
  0x27   :  { %478 = vmatpush3.bf16.msra.mxu0 %v477_v58 }
  0xda   :  { %v110_v52 = vpop.f32.mrb[0].mxu0 }
  0xdb   :  { %v111_v53 = vadd.f32 %v308_v51, %v110_v52  ;;  %v356_v54 = vpop.f32.mrb[1].mxu0 }
  0xdd   :  { %v114_v55 = vmax.f32 %v111_v53, 0.0 }
  0xdf   :  { %390 = vmatmul.mubr.f32.vlgmr.msra.gmra.mrb[0].mxu1 %v114_v55 }
 0x1b2   :  { %v204_v60 = vpop.f32.mrb[0].mxu1 }
 0x1b3   :  { %v205_v61 = vadd.f32 %v311_v59, %v204_v60  ;;  %v391_v62 = vpop.f32.mrb[1].mxu1 }
 0x1b5   :  { %v208_v63 = vmax.f32 %v205_v61, 0.0 }
 0x1b7   :  { %425 = vmatmul.mubr.f32.vlgmr.msra.gmra.mrb[2].mxu0 %v208_v63 }
 0x28a   :  { %v298_v1 = vpop.f32.mrb[2].mxu0 }
 0x28b   :  { %v299_v2 = vadd.f32 %v312_v0, %v298_v1  ;;  %v426_v3 = vpop.f32.mrb[3].mxu0 }
 0x28d   :  { %303 = vst.msk [vmem:[%s671_s7] sm:$0xff] %vm302_vm5, %v299_v2 }

</bundles_post_ra>
